<compile_context>
chip_gen: v6e
topology: v6e:2x2x1
jax: 0.10.0
libtpu: 0.0.40
codegen_flags: <defaults>
</compile_context>

<pallas_src>
import jax
import jax.numpy as jnp
from jax.experimental import pallas as pl
from jax.experimental.pallas import tpu as pltpu

NF = 50            # input features (nf=50)
H1, H2, H3 = 256, 128, 64
NF_PAD = 64        # first-matmul K padded to a clean tile (in-kernel)
W4_ROWS = 8        # w4^T padded to 8 sublanes for the MXU
LEAKY = 0.2


def _round_up(n, m):
    return ((n + m - 1) // m) * m


def _leaky_relu(x):
    return jnp.where(x > 0, x, LEAKY * x)


def _pick_tile(B, block_batch):
    """Pick (TB, B_pad). TB is a multiple of 128 whenever there is >1 grid step."""
    bb = max(128, _round_up(block_batch, 128))
    if B > bb:
        tb = bb                                 # many lane-aligned steps
    elif B >= 512:
        tb = _round_up(pl.cdiv(B, 2), 128)      # >=2 steps so both v7x TCs get work
    else:
        tb = _round_up(B, 16)                   # single step for small batches
    return tb, _round_up(B, tb)


def _disc_kernel(x_ref,
                 w1_ref, b1_ref,
                 w2_ref, b2_ref,
                 w3_ref, b3_ref,
                 w4t_ref, b4_ref,
                 o_ref,
                 xpad_ref):
    # cdt = matmul operand dtype (bf16 or f32); accumulation always f32 (MXU);
    # bias / LeakyReLU / sigmoid always f32 (VPU/EUP, v5e-safe).
    cdt = w1_ref.dtype

    # In-kernel cast + zero-pad of x: K 50 -> 64 (numerically exact).
    # Fully rewritten every step, so it is safe under "parallel" core splitting.
    xpad_ref[...] = jnp.zeros_like(xpad_ref)
    xpad_ref[:, :NF] = x_ref[...].astype(cdt)
    xp = xpad_ref[...]                                             # (TB, 64)

    h = jnp.dot(xp, w1_ref[...], preferred_element_type=jnp.float32) + b1_ref[...]
    h = _leaky_relu(h)
    h = jnp.dot(h.astype(cdt), w2_ref[...], preferred_element_type=jnp.float32) + b2_ref[...]
    h = _leaky_relu(h)
    h = jnp.dot(h.astype(cdt), w3_ref[...], preferred_element_type=jnp.float32) + b3_ref[...]
    h = _leaky_relu(h)                                             # (TB, 64) f32

    # Final layer, batch-major / lane-dense output: contract w4^T (8, 64) with
    # h3 (TB, 64) over the 64 features -> (8, TB); only row 0 is real.
    logits = jax.lax.dot_general(
        w4t_ref[...], h.astype(cdt),
        dimension_numbers=(((1,), (1,)), ((), ())),
        preferred_element_type=jnp.float32)
    o_ref[...] = jax.nn.sigmoid(logits[0:1, :] + b4_ref[...]).astype(o_ref.dtype)


def prepare_params(params, matmul_dtype=jnp.bfloat16):
    """One-time pad/cast of the weights (hoisted out of the forward call)."""
    cdt = matmul_dtype
    w1 = jnp.zeros((NF_PAD, H1), cdt).at[:NF, :].set(params["w1"].astype(cdt))
    w2 = params["w2"].astype(cdt)
    w3 = params["w3"].astype(cdt)
    w4t = jnp.zeros((W4_ROWS, H3), cdt).at[0, :].set(params["w4"][:, 0].astype(cdt))
    return {
        "w1": w1, "w2": w2, "w3": w3, "w4t": w4t,
        "b1": params["b1"].reshape(1, H1).astype(jnp.float32),
        "b2": params["b2"].reshape(1, H2).astype(jnp.float32),
        "b3": params["b3"].reshape(1, H3).astype(jnp.float32),
        "b4": params["b4"].reshape(1, 1).astype(jnp.float32),
    }


def discriminator_forward(x, prepared, *, block_batch=2048):
    """x: [B, NF] float32. prepared: output of prepare_params. Returns [B, 1] f32."""
    B = x.shape[0]
    TB, B_pad = _pick_tile(B, block_batch)

    xb = x.astype(jnp.float32)
    if B_pad != B:
        xb = jnp.zeros((B_pad, NF), jnp.float32).at[:B].set(xb)

    w1, w2, w3, w4t = prepared["w1"], prepared["w2"], prepared["w3"], prepared["w4t"]
    b1, b2, b3, b4 = prepared["b1"], prepared["b2"], prepared["b3"], prepared["b4"]

    # Constant index_map => block never changes => DMA'd once, resident in VMEM.
    resident = lambda a: pl.BlockSpec(a.shape, lambda i: (0, 0))

    out = pl.pallas_call(
        _disc_kernel,
        out_shape=jax.ShapeDtypeStruct((1, B_pad), jnp.float32),
        grid=(B_pad // TB,),
        in_specs=[
            pl.BlockSpec((TB, NF), lambda i: (i, 0)),      # x tiled over batch, raw f32
            resident(w1), resident(b1),
            resident(w2), resident(b2),
            resident(w3), resident(b3),
            resident(w4t), resident(b4),
        ],
        out_specs=pl.BlockSpec((1, TB), lambda i: (0, i)), # batch along lanes, lane-dense
        scratch_shapes=[pltpu.VMEM((TB, NF_PAD), w1.dtype)],
        compiler_params=pltpu.CompilerParams(
            dimension_semantics=("parallel",),             # shard batch tiles across TCs (v7x)
        ),
    )(xb, w1, b1, w2, b2, w3, b3, w4t, b4)

    return out[:, :B].T


def init_params(key):
    """Deterministic init mimicking nn.Linear default: U(-1/sqrt(fan_in), 1/sqrt(fan_in))."""
    dims = [(NF, H1), (H1, H2), (H2, H3), (H3, 1)]
    params = {}
    keys = jax.random.split(key, 2 * len(dims))
    for i, (fin, fout) in enumerate(dims):
        bound = 1.0 / jnp.sqrt(jnp.float32(fin))
        w = jax.random.uniform(keys[2 * i], (fin, fout), jnp.float32, -bound, bound)
        b = jax.random.uniform(keys[2 * i + 1], (1, fout), jnp.float32, -bound, bound)
        params[f"w{i+1}"] = w
        params[f"b{i+1}"] = b
    return params


def reference_forward(x, params, matmul_dtype=jnp.float32):
    """Pure-JAX reference mirroring the kernel's dtype policy."""
    cdt = matmul_dtype
    h = jnp.dot(x.astype(cdt), params["w1"].astype(cdt),
                preferred_element_type=jnp.float32) + params["b1"]
    h = jnp.where(h > 0, h, LEAKY * h)
    h = jnp.dot(h.astype(cdt), params["w2"].astype(cdt),
                preferred_element_type=jnp.float32) + params["b2"]
    h = jnp.where(h > 0, h, LEAKY * h)
    h = jnp.dot(h.astype(cdt), params["w3"].astype(cdt),
                preferred_element_type=jnp.float32) + params["b3"]
    h = jnp.where(h > 0, h, LEAKY * h)
    h = jnp.dot(h.astype(cdt), params["w4"].astype(cdt),
                preferred_element_type=jnp.float32) + params["b4"]
    return jax.nn.sigmoid(h)


if __name__ == "__main__":
    key = jax.random.PRNGKey(0)
    pkey, xkey, xkey2 = jax.random.split(key, 3)
    params = init_params(pkey)

    # Small batch, single grid step.
    B = 8
    x = jax.random.normal(xkey, (B, NF), jnp.float32)

    # Exact-f32 path: must match the pure-f32 reference tightly.
    prep_f32 = prepare_params(params, jnp.float32)
    out_f32 = jax.block_until_ready(discriminator_forward(x, prep_f32))
    ref_f32 = reference_forward(x, params, jnp.float32)
    assert out_f32.shape == (B, 1), out_f32.shape
    assert jnp.allclose(out_f32, ref_f32, atol=1e-5, rtol=1e-5), (out_f32, ref_f32)

    # Default fast path (bf16 operands, f32 accumulation).
    prep_bf = prepare_params(params)
    out_bf = jax.block_until_ready(discriminator_forward(x, prep_bf))
    ref_bf = reference_forward(x, params, jnp.bfloat16)
    assert out_bf.shape == (B, 1), out_bf.shape
    assert jnp.allclose(out_bf, ref_bf, atol=1e-4, rtol=1e-3), (out_bf, ref_bf)
    assert jnp.allclose(out_bf, ref_f32, atol=3e-2), (out_bf, ref_f32)

    # Larger batch exercising the multi-tile (>=2 grid step) path + row padding.
    B2 = 640
    x2 = jax.random.normal(xkey2, (B2, NF), jnp.float32)
    out2 = jax.block_until_ready(discriminator_forward(x2, prep_bf))
    ref2_bf = reference_forward(x2, params, jnp.bfloat16)
    ref2_f32 = reference_forward(x2, params, jnp.float32)
    assert out2.shape == (B2, 1), out2.shape
    assert jnp.allclose(out2, ref2_bf, atol=1e-4, rtol=1e-3)
    assert jnp.allclose(out2, ref2_f32, atol=3e-2)

    print("KERNEL_OK")
</pallas_src>

<mosaic_0001>
module attributes {stable_mosaic.version = 11 : i64} {
  func.func @_disc_kernel(%arg0: i32, %arg1: memref<16x50xf32, #tpu.memory_space<vmem>>, %arg2: memref<64x256xf32, #tpu.memory_space<vmem>>, %arg3: memref<1x256xf32, #tpu.memory_space<vmem>>, %arg4: memref<256x128xf32, #tpu.memory_space<vmem>>, %arg5: memref<1x128xf32, #tpu.memory_space<vmem>>, %arg6: memref<128x64xf32, #tpu.memory_space<vmem>>, %arg7: memref<1x64xf32, #tpu.memory_space<vmem>>, %arg8: memref<8x64xf32, #tpu.memory_space<vmem>>, %arg9: memref<1x1xf32, #tpu.memory_space<vmem>>, %arg10: memref<1x16xf32, #tpu.memory_space<vmem>>, %arg11: memref<16x64xf32, #tpu.memory_space<vmem>>) attributes {dimension_semantics = [#tpu.dimension_semantics<parallel>], iteration_bounds = array<i64: 1>, scalar_prefetch = 0 : i64, scratch_operands = 1 : i64, tpu.core_type = #tpu.core_type<tc>, window_params = [{transform_indices = @transform_0, window_bounds = array<i64: 16, 50>}, {pipeline_mode = #tpu.pipeline_mode<synchronous>, transform_indices = @transform_1, window_bounds = array<i64: 64, 256>}, {pipeline_mode = #tpu.pipeline_mode<synchronous>, transform_indices = @transform_2, window_bounds = array<i64: 1, 256>}, {pipeline_mode = #tpu.pipeline_mode<synchronous>, transform_indices = @transform_3, window_bounds = array<i64: 256, 128>}, {pipeline_mode = #tpu.pipeline_mode<synchronous>, transform_indices = @transform_4, window_bounds = array<i64: 1, 128>}, {pipeline_mode = #tpu.pipeline_mode<synchronous>, transform_indices = @transform_5, window_bounds = array<i64: 128, 64>}, {pipeline_mode = #tpu.pipeline_mode<synchronous>, transform_indices = @transform_6, window_bounds = array<i64: 1, 64>}, {pipeline_mode = #tpu.pipeline_mode<synchronous>, transform_indices = @transform_7, window_bounds = array<i64: 8, 64>}, {pipeline_mode = #tpu.pipeline_mode<synchronous>, transform_indices = @transform_8, window_bounds = array<i64: 1, 1>}, {transform_indices = @transform_9, window_bounds = array<i64: 1, 16>}]} {
    %cst = arith.constant 0.000000e+00 : f32
    %0 = vector.broadcast %cst : f32 to vector<16x64xf32>
    %c0 = arith.constant 0 : index
    %c0_0 = arith.constant 0 : index
    %1 = vector.load %arg11[%c0, %c0_0] : memref<16x64xf32, #tpu.memory_space<vmem>>, vector<16x64xf32>
    tpu.vector_store %arg11[%c0, %c0_0], %0 {strides = array<i32>} : memref<16x64xf32, #tpu.memory_space<vmem>>, vector<16x64xf32>,
    %c0_1 = arith.constant 0 : index
    %c0_2 = arith.constant 0 : index
    %2 = vector.load %arg1[%c0_1, %c0_2] : memref<16x50xf32, #tpu.memory_space<vmem>>, vector<16x50xf32>
    %c0_3 = arith.constant 0 : index
    %c0_4 = arith.constant 0 : index
    %3 = vector.load %arg11[%c0_3, %c0_4] : memref<16x64xf32, #tpu.memory_space<vmem>>, vector<16x50xf32>
    tpu.vector_store %arg11[%c0_3, %c0_4], %2 {strides = array<i32>} : memref<16x64xf32, #tpu.memory_space<vmem>>, vector<16x50xf32>,
    %c0_5 = arith.constant 0 : index
    %c0_6 = arith.constant 0 : index
    %4 = vector.load %arg11[%c0_5, %c0_6] : memref<16x64xf32, #tpu.memory_space<vmem>>, vector<16x64xf32>
    %c0_7 = arith.constant 0 : index
    %c0_8 = arith.constant 0 : index
    %5 = vector.load %arg2[%c0_7, %c0_8] : memref<64x256xf32, #tpu.memory_space<vmem>>, vector<64x256xf32>
    %cst_9 = arith.constant dense<0.000000e+00> : vector<16x256xf32>
    %6 = tpu.matmul %4, %5, %cst_9 {dimension_numbers = #tpu.dot_dimension_numbers<[1], [0], [0], [1], [0, 0, 1, 1], [], []>} : vector<16x64xf32>, vector<64x256xf32>, vector<16x256xf32> -> vector<16x256xf32>
    %c0_10 = arith.constant 0 : index
    %c0_11 = arith.constant 0 : index
    %7 = vector.load %arg3[%c0_10, %c0_11] : memref<1x256xf32, #tpu.memory_space<vmem>>, vector<1x256xf32>
    %8 = vector.broadcast %7 : vector<1x256xf32> to vector<16x256xf32>
    %9 = arith.addf %6, %8 : vector<16x256xf32>
    %cst_12 = arith.constant 0.000000e+00 : f32
    %10 = vector.broadcast %cst_12 : f32 to vector<16x256xf32>
    %11 = arith.cmpf ogt, %9, %10 : vector<16x256xf32>
    %cst_13 = arith.constant 2.000000e-01 : f32
    %12 = vector.broadcast %cst_13 : f32 to vector<16x256xf32>
    %13 = arith.mulf %12, %9 : vector<16x256xf32>
    %14 = arith.select %11, %9, %13 : vector<16x256xi1>, vector<16x256xf32>
    %c0_14 = arith.constant 0 : index
    %c0_15 = arith.constant 0 : index
    %15 = vector.load %arg4[%c0_14, %c0_15] : memref<256x128xf32, #tpu.memory_space<vmem>>, vector<256x128xf32>
    %cst_16 = arith.constant dense<0.000000e+00> : vector<16x128xf32>
    %16 = tpu.matmul %14, %15, %cst_16 {dimension_numbers = #tpu.dot_dimension_numbers<[1], [0], [0], [1], [0, 0, 1, 1], [], []>} : vector<16x256xf32>, vector<256x128xf32>, vector<16x128xf32> -> vector<16x128xf32>
    %c0_17 = arith.constant 0 : index
    %c0_18 = arith.constant 0 : index
    %17 = vector.load %arg5[%c0_17, %c0_18] : memref<1x128xf32, #tpu.memory_space<vmem>>, vector<1x128xf32>
    %18 = vector.broadcast %17 : vector<1x128xf32> to vector<16x128xf32>
    %19 = arith.addf %16, %18 : vector<16x128xf32>
    %cst_19 = arith.constant 0.000000e+00 : f32
    %20 = vector.broadcast %cst_19 : f32 to vector<16x128xf32>
    %21 = arith.cmpf ogt, %19, %20 : vector<16x128xf32>
    %cst_20 = arith.constant 2.000000e-01 : f32
    %22 = vector.broadcast %cst_20 : f32 to vector<16x128xf32>
    %23 = arith.mulf %22, %19 : vector<16x128xf32>
    %24 = arith.select %21, %19, %23 : vector<16x128xi1>, vector<16x128xf32>
    %c0_21 = arith.constant 0 : index
    %c0_22 = arith.constant 0 : index
    %25 = vector.load %arg6[%c0_21, %c0_22] : memref<128x64xf32, #tpu.memory_space<vmem>>, vector<128x64xf32>
    %cst_23 = arith.constant dense<0.000000e+00> : vector<16x64xf32>
    %26 = tpu.matmul %24, %25, %cst_23 {dimension_numbers = #tpu.dot_dimension_numbers<[1], [0], [0], [1], [0, 0, 1, 1], [], []>} : vector<16x128xf32>, vector<128x64xf32>, vector<16x64xf32> -> vector<16x64xf32>
    %c0_24 = arith.constant 0 : index
    %c0_25 = arith.constant 0 : index
    %27 = vector.load %arg7[%c0_24, %c0_25] : memref<1x64xf32, #tpu.memory_space<vmem>>, vector<1x64xf32>
    %28 = vector.broadcast %27 : vector<1x64xf32> to vector<16x64xf32>
    %29 = arith.addf %26, %28 : vector<16x64xf32>
    %cst_26 = arith.constant 0.000000e+00 : f32
    %30 = vector.broadcast %cst_26 : f32 to vector<16x64xf32>
    %31 = arith.cmpf ogt, %29, %30 : vector<16x64xf32>
    %cst_27 = arith.constant 2.000000e-01 : f32
    %32 = vector.broadcast %cst_27 : f32 to vector<16x64xf32>
    %33 = arith.mulf %32, %29 : vector<16x64xf32>
    %34 = arith.select %31, %29, %33 : vector<16x64xi1>, vector<16x64xf32>
    %c0_28 = arith.constant 0 : index
    %c0_29 = arith.constant 0 : index
    %35 = vector.load %arg8[%c0_28, %c0_29] : memref<8x64xf32, #tpu.memory_space<vmem>>, vector<8x64xf32>
    %cst_30 = arith.constant dense<0.000000e+00> : vector<8x16xf32>
    %36 = tpu.matmul %35, %34, %cst_30 {dimension_numbers = #tpu.dot_dimension_numbers<[1], [1], [0], [0], [0, 0, 1, 0], [], []>} : vector<8x64xf32>, vector<16x64xf32>, vector<8x16xf32> -> vector<8x16xf32>
    %37 = vector.extract_strided_slice %36 {offsets = [0, 0], sizes = [1, 16], strides = [1, 1]} : vector<8x16xf32> to vector<1x16xf32>
    %c0_31 = arith.constant 0 : index
    %c0_32 = arith.constant 0 : index
    %38 = vector.load %arg9[%c0_31, %c0_32] : memref<1x1xf32, #tpu.memory_space<vmem>>, vector<1x1xf32>
    %39 = vector.broadcast %38 : vector<1x1xf32> to vector<1x16xf32>
    %40 = arith.addf %37, %39 : vector<1x16xf32>
    %41 = arith.negf %40 : vector<1x16xf32>
    %42 = math.exp %41 : vector<1x16xf32>
    %cst_33 = arith.constant 1.000000e+00 : f32
    %43 = vector.broadcast %cst_33 : f32 to vector<1x16xf32>
    %44 = arith.addf %43, %42 : vector<1x16xf32>
    %45 = arith.divf %43, %44 : vector<1x16xf32>
    %c0_34 = arith.constant 0 : index
    %c0_35 = arith.constant 0 : index
    %46 = vector.load %arg10[%c0_34, %c0_35] : memref<1x16xf32, #tpu.memory_space<vmem>>, vector<1x16xf32>
    tpu.vector_store %arg10[%c0_34, %c0_35], %45 {strides = array<i32>} : memref<1x16xf32, #tpu.memory_space<vmem>>, vector<1x16xf32>,
    return
  }
  func.func @transform_0(%arg0: i32) -> (i32, i32) {
    %c0_i32 = arith.constant 0 : i32
    %c0_i32_0 = arith.constant 0 : i32
    return %arg0, %c0_i32 : i32, i32
  }
  func.func @transform_1(%arg0: i32) -> (i32, i32) {
    %c0_i32 = arith.constant 0 : i32
    %c0_i32_0 = arith.constant 0 : i32
    %c0_i32_1 = arith.constant 0 : i32
    return %c0_i32, %c0_i32_0 : i32, i32
  }
  func.func @transform_2(%arg0: i32) -> (i32, i32) {
    %c0_i32 = arith.constant 0 : i32
    %c0_i32_0 = arith.constant 0 : i32
    %c0_i32_1 = arith.constant 0 : i32
    return %c0_i32, %c0_i32_0 : i32, i32
  }
  func.func @transform_3(%arg0: i32) -> (i32, i32) {
    %c0_i32 = arith.constant 0 : i32
    %c0_i32_0 = arith.constant 0 : i32
    %c0_i32_1 = arith.constant 0 : i32
    return %c0_i32, %c0_i32_0 : i32, i32
  }
  func.func @transform_4(%arg0: i32) -> (i32, i32) {
    %c0_i32 = arith.constant 0 : i32
    %c0_i32_0 = arith.constant 0 : i32
    %c0_i32_1 = arith.constant 0 : i32
    return %c0_i32, %c0_i32_0 : i32, i32
  }
  func.func @transform_5(%arg0: i32) -> (i32, i32) {
    %c0_i32 = arith.constant 0 : i32
    %c0_i32_0 = arith.constant 0 : i32
    %c0_i32_1 = arith.constant 0 : i32
    return %c0_i32, %c0_i32_0 : i32, i32
  }
  func.func @transform_6(%arg0: i32) -> (i32, i32) {
    %c0_i32 = arith.constant 0 : i32
    %c0_i32_0 = arith.constant 0 : i32
    %c0_i32_1 = arith.constant 0 : i32
    return %c0_i32, %c0_i32_0 : i32, i32
  }
  func.func @transform_7(%arg0: i32) -> (i32, i32) {
    %c0_i32 = arith.constant 0 : i32
    %c0_i32_0 = arith.constant 0 : i32
    %c0_i32_1 = arith.constant 0 : i32
    return %c0_i32, %c0_i32_0 : i32, i32
  }
  func.func @transform_8(%arg0: i32) -> (i32, i32) {
    %c0_i32 = arith.constant 0 : i32
    %c0_i32_0 = arith.constant 0 : i32
    %c0_i32_1 = arith.constant 0 : i32
    return %c0_i32, %c0_i32_0 : i32, i32
  }
  func.func @transform_9(%arg0: i32) -> (i32, i32) {
    %c0_i32 = arith.constant 0 : i32
    %c0_i32_0 = arith.constant 0 : i32
    return %c0_i32, %arg0 : i32, i32
  }
}

</mosaic_0001>

<bundles_post_ra>
// kernel: tpu_custom_call.1
= control target key start
LH: loop header
LB: loop body
LE: loop exit
PB: predicated region body
PF: predicated region fallthrough
CT: control target
= control target key end

     0   :  { %s887_s0 = inlined_call_operand.vmem [shape: f32[16,50], index: 0, kind: input, shape index: {}]   ;;  %s888_s1 = inlined_call_operand.vmem [shape: f32[64,256], index: 1, kind: input, shape index: {}]   ;;  %s889_s2 = inlined_call_operand.vmem [shape: f32[1,256], index: 2, kind: input, shape index: {}]   ;;  %s890_s3 = inlined_call_operand.hbm [shape: f32[256,128], index: 3, kind: input, shape index: {}]   ;;  %s891_s4 = inlined_call_operand.vmem [shape: f32[1,128], index: 4, kind: input, shape index: {}]   ;;  %s892_s5 = inlined_call_operand.vmem [shape: f32[128,64], index: 5, kind: input, shape index: {}]   ;;  %s893_s6 = inlined_call_operand.vmem [shape: f32[1,64], index: 6, kind: input, shape index: {}]   ;;  %s894_s7 = inlined_call_operand.vmem [shape: f32[8,64], index: 7, kind: input, shape index: {}]   ;;  %s895_s8 = inlined_call_operand.<no memory space> [shape: f32[1,1], index: 8, kind: input, shape index: {}]   ;;  %s896_s9 = inlined_call_operand.hbm [shape: f32[1,16], index: 9, kind: output, shape index: {}]  }
   0x1   :  { %v14_v0 = vstv %s895_s8 }
   0x2   :  { %15 = vst [vmem:[#allocation3] sm:$0x1] %v14_v0 }
   0x3   :  { %16 = vsyncpa [#allocation5], 0 }
   0x4   :  { %17 = vsyncpa [#allocation6], 0  ;;  %s685_s11 = smov [#allocation4]  }
   0x5   :  { %s29_s12 = sshll.u32 %s685_s11, 4  ;;  %s30_s12 = int_to_ptr.vmem [resolvable:$true] %s29_s12 }
   0x6   :  { %s649_s13 = scalar_lea.vmem %s30_s12, 4096  ;;  %p654_p1 = scmp.lt.s32.totalorder %s30_s12, %s30_s12 }
   0x7   :  { %p650_p0 = scmp.ne.s32.totalorder %s30_s12, %s649_s13  ;;  %p655_p2 = scmp.lt.s32.totalorder %s649_s13, %s649_s13 }
   0x9   :  { %p656_p3 = por %p655_p2, %p654_p1 }
   0xb   :  { %p657_p4 = pnand %p656_p3, %p650_p0 }
   0xd   :  { %660 = shalt.err (!%p657_p4)
}
   0xe   :  { %s686_s14 = smov 128   ;;  %s687_s15 = smov 8  }
   0xf   :  { %35 = dma.hbm_to_vmem [thread:$0]  %s890_s3, 4096, %s30_s12, [#allocation5], %s686_s14, %s686_s14, %s687_s15  }
  0x10   :  { %681 = dma.done.wait [#allocation5], 4096  }
  0x11   :  { %682 = vsyncadd [#allocation5], 4294963200  ;;  %vm49_vm0 = vcmask 523264   ;;  %v688_v1 = vmov 0.0   ;;  %v74_v2 = vld [vmem:[%s888_s1 + $0x78] sm:$0xff]  ;;  %v73_v3 = vld [vmem:[%s888_s1 + $0x70] sm:$0xff]  ;;  %v77_v63 = vlaneseq }
  0x12   :  { %157 = vmatprep.mubr.f32.mxu0 %v688_v1  ;;  %50 = vst.msk [vmem:[#allocation2] sm:$0xff] %vm49_vm0, %v688_v1  ;;  %51 = vst.msk [vmem:[#allocation2 + $0x8] sm:$0xff] %vm49_vm0, %v688_v1  ;;  %v72_v4 = vld [vmem:[%s888_s1 + $0x68] sm:$0xff]  ;;  %109 = vmatprep.subr.mxu0 %v74_v2  ;;  %v71_v5 = vld [vmem:[%s888_s1 + $0x60] sm:$0xff]  ;;  %vm54_vm1 = vcmask 408576   ;;  %vm689_vm8 = vmmov 0  }
  0x13   :  { %110 = vmatpush1.msra.mxu0 %v73_v3  ;;  %v70_v6 = vld [vmem:[%s888_s1 + $0x58] sm:$0xff]  ;;  %v69_v7 = vld [vmem:[%s888_s1 + $0x50] sm:$0xff]  ;;  %v68_v8 = vld [vmem:[%s888_s1 + $0x48] sm:$0xff]  ;;  %v838_v0 = vshrl.u32 %v77_v63, 7  ;;  %vm503_vm11 = vcmask 122880  }
  0x14   :  { %111 = vmatprep.subr.mxu0 %v72_v4  ;;  %v67_v9 = vld [vmem:[%s888_s1 + $0x40] sm:$0xff]  ;;  %v66_v10 = vld [vmem:[%s888_s1 + $0x38] sm:$0xff]  ;;  %v53_v12 = vld [vmem:[%s887_s0 + $0x8] sm:$0xff] }
  0x15   :  { %112 = vmatpush1.msra.mxu0 %v71_v5  ;;  %v52_v11 = vld [vmem:[%s887_s0] sm:$0xff]  ;;  %56 = vst.msk [vmem:[#allocation2 + $0x8] sm:$0xff] %vm54_vm1, %v53_v12  ;;  %v213_v13 = vld [vmem:[#allocation4 + $0xf8] sm:$0xff]  ;;  %v62_v22 = vld [vmem:[%s888_s1 + $0x18] sm:$0xff]  ;;  %v79_v2 = vsub.s32 0, %v838_v0  ;;  %v83_v4 = vsub.s32 1, %v838_v0 }
  0x16   :  { %113 = vmatprep.subr.mxu0 %v70_v6  ;;  %55 = vst.msk [vmem:[#allocation2] sm:$0xff] %vm54_vm1, %v52_v11  ;;  %v197_v14 = vld [vmem:[#allocation4 + $0x78] sm:$0xff]  ;;  %v212_v15 = vld [vmem:[#allocation4 + $0xf0] sm:$0xff]  ;;  %528 = vmatprep.subr.mxu1 %v213_v13  ;;  %v211_v19 = vld [vmem:[#allocation4 + $0xe8] sm:$0xff] }
  0x17   :  { %114 = vmatpush1.msra.mxu0 %v69_v7  ;;  %v65_v16 = vld [vmem:[%s888_s1 + $0x30] sm:$0xff]  ;;  %v196_v17 = vld [vmem:[#allocation4 + $0x70] sm:$0xff]  ;;  %529 = vmatpush3.msra.mxu1 %v197_v14  ;;  %v195_v21 = vld [vmem:[#allocation4 + $0x68] sm:$0xff] }
  0x18   :  { %115 = vmatprep.subr.mxu0 %v68_v8  ;;  %v64_v18 = vld [vmem:[%s888_s1 + $0x28] sm:$0xff]  ;;  %v63_v20 = vld [vmem:[%s888_s1 + $0x20] sm:$0xff]  ;;  %530 = vmatprep.subr.mxu1 %v212_v15  ;;  %v210_v23 = vld [vmem:[#allocation4 + $0xe0] sm:$0xff] }
  0x19   :  { %116 = vmatpush1.msra.mxu0 %v67_v9  ;;  %531 = vmatpush3.msra.mxu1 %v196_v17  ;;  %v61_v24 = vld [vmem:[%s888_s1 + $0x10] sm:$0xff]  ;;  %v60_v26 = vld [vmem:[%s888_s1 + $0x8] sm:$0xff]  ;;  %v59_v28 = vld [vmem:[%s888_s1] sm:$0xff] }
  0x1a   :  { %117 = vmatprep.subr.mxu0 %v66_v10  ;;  %532 = vmatprep.subr.mxu1 %v211_v19  ;;  %v194_v25 = vld [vmem:[#allocation4 + $0x60] sm:$0xff]  ;;  %v209_v27 = vld [vmem:[#allocation4 + $0xd8] sm:$0xff]  ;;  %v208_v31 = vld [vmem:[#allocation4 + $0xd0] sm:$0xff] }
  0x1b   :  { %118 = vmatpush1.msra.mxu0 %v65_v16  ;;  %533 = vmatpush3.msra.mxu1 %v195_v21  ;;  %v193_v29 = vld [vmem:[#allocation4 + $0x58] sm:$0xff]  ;;  %v192_v32 = vld [vmem:[#allocation4 + $0x50] sm:$0xff]  ;;  %v207_v33 = vld [vmem:[#allocation4 + $0xc8] sm:$0xff] }
  0x1c   :  { %119 = vmatprep.subr.mxu0 %v64_v18  ;;  %534 = vmatprep.subr.mxu1 %v210_v23  ;;  %v191_v34 = vld [vmem:[#allocation4 + $0x48] sm:$0xff]  ;;  %v58_v35 = vld [vmem:[#allocation2 + $0x8] sm:$0xff]  ;;  %v206_v36 = vld [vmem:[#allocation4 + $0xc0] sm:$0xff] }
  0x1d   :  { %120 = vmatpush1.msra.mxu0 %v63_v20  ;;  %v57_v30 = vld [vmem:[#allocation2] sm:$0xff]  ;;  %535 = vmatpush3.msra.mxu1 %v194_v25  ;;  %v190_v37 = vld [vmem:[#allocation4 + $0x40] sm:$0xff]  ;;  %v205_v38 = vld [vmem:[#allocation4 + $0xb8] sm:$0xff] }
  0x1e   :  { %121 = vmatprep.subr.mxu0 %v62_v22  ;;  %536 = vmatprep.subr.mxu1 %v209_v27  ;;  %v189_v39 = vld [vmem:[#allocation4 + $0x38] sm:$0xff]  ;;  %v204_v40 = vld [vmem:[#allocation4 + $0xb0] sm:$0xff]  ;;  %v203_v42 = vld [vmem:[#allocation4 + $0xa8] sm:$0xff] }
  0x1f   :  { %122 = vmatpush1.msra.mxu0 %v61_v24  ;;  %537 = vmatpush3.msra.mxu1 %v193_v29  ;;  %v188_v41 = vld [vmem:[#allocation4 + $0x30] sm:$0xff]  ;;  %v187_v43 = vld [vmem:[#allocation4 + $0x28] sm:$0xff]  ;;  %v202_v44 = vld [vmem:[#allocation4 + $0xa0] sm:$0xff] }
  0x20   :  { %123 = vmatprep.subr.mxu0 %v60_v26  ;;  %538 = vmatprep.subr.mxu1 %v208_v31  ;;  %v186_v45 = vld [vmem:[#allocation4 + $0x20] sm:$0xff]  ;;  %v201_v46 = vld [vmem:[#allocation4 + $0x98] sm:$0xff]  ;;  %v200_v48 = vld [vmem:[#allocation4 + $0x90] sm:$0xff] }
  0x21   :  { %124 = vmatpush1.msra.mxu0 %v59_v28  ;;  %539 = vmatpush3.msra.mxu1 %v192_v32  ;;  %v185_v47 = vld [vmem:[#allocation4 + $0x18] sm:$0xff]  ;;  %v184_v49 = vld [vmem:[#allocation4 + $0x10] sm:$0xff]  ;;  %v199_v50 = vld [vmem:[#allocation4 + $0x88] sm:$0xff] }
  0x22   :  { %520 = vmatmul.mubr.msk.f32.vlgmr.msra.gmra.mxu0 %vm49_vm0, %v57_v30  ;;  %540 = vmatprep.subr.mxu1 %v207_v33  ;;  %v183_v51 = vld [vmem:[#allocation4 + $0x8] sm:$0xff]  ;;  %v198_v52 = vld [vmem:[#allocation4 + $0x80] sm:$0xff]  ;;  %v315_v56 = vld [vmem:[%s892_s5 + $0x68] sm:$0xff] }
  0x23   :  { %163 = vmatprep.mubr.f32.mxu0 %v688_v1  ;;  %541 = vmatpush3.msra.mxu1 %v191_v34  ;;  %v182_v53 = vld [vmem:[#allocation4] sm:$0xff]  ;;  %v314_v57 = vld [vmem:[%s892_s5 + $0x60] sm:$0xff]  ;;  %v311_v60 = vld [vmem:[%s892_s5 + $0x48] sm:$0xff] }
  0x24   :  { %542 = vmatprep.subr.mxu1 %v206_v36  ;;  %v317_v54 = vld [vmem:[%s892_s5 + $0x78] sm:$0xff]  ;;  %v316_v55 = vld [vmem:[%s892_s5 + $0x70] sm:$0xff]  ;;  %v310_v61 = vld [vmem:[%s892_s5 + $0x40] sm:$0xff] }
  0x25   :  { %543 = vmatpush3.msra.mxu1 %v190_v37  ;;  %587 = vmatprep.subr.mxu0 %v317_v54  ;;  %v313_v58 = vld [vmem:[%s892_s5 + $0x58] sm:$0xff]  ;;  %v312_v59 = vld [vmem:[%s892_s5 + $0x50] sm:$0xff]  ;;  %v75_v3 = vld [vmem:[%s889_s2] sm:$0x3] }
  0x26   :  { %521 = vmatmul.mubr.msk.f32.gmra.mxu0 %vm49_vm0, %v58_v35  ;;  %544 = vmatprep.subr.mxu1 %v205_v38  ;;  %v309_v62 = vld [vmem:[%s892_s5 + $0x38] sm:$0xff]  ;;  %v80_v5 = vrot.slane %v75_v3, %v79_v2  ;;  %v84_v6 = vrot.slane %v75_v3, %v83_v4  ;;  %v308_v23 = vld [vmem:[%s892_s5 + $0x30] sm:$0xff]  ;;  %v307_v24 = vld [vmem:[%s892_s5 + $0x28] sm:$0xff] }
  0x27   :  { %545 = vmatpush3.msra.mxu1 %v189_v39  ;;  %588 = vmatpush3.msra.mxu0 %v317_v54  ;;  %v306_v25 = vld [vmem:[%s892_s5 + $0x20] sm:$0xff]  ;;  %v305_v26 = vld [vmem:[%s892_s5 + $0x18] sm:$0xff]  ;;  %v304_v27 = vld [vmem:[%s892_s5 + $0x10] sm:$0xff] }
  0x28   :  { %546 = vmatprep.subr.mxu1 %v204_v40  ;;  %589 = vmatprep.subr.mxu0 %v316_v55  ;;  %v303_v28 = vld [vmem:[%s892_s5 + $0x8] sm:$0xff]  ;;  %v302_v29 = vld [vmem:[%s892_s5] sm:$0xff] }
  0x29   :  { %547 = vmatpush3.msra.mxu1 %v188_v41  ;;  %590 = vmatpush3.msra.mxu0 %v316_v55  ;;  %v522_v31 = vld [vmem:[%s891_s4] ss:$0 sm:$0xff] }
  0x2a   :  { %548 = vmatprep.subr.mxu1 %v203_v42  ;;  %591 = vmatprep.subr.mxu0 %v315_v56  ;;  %v406_v54 = vld [vmem:[%s894_s7] sm:$0xff] }
  0x2b   :  { %549 = vmatpush3.msra.mxu1 %v187_v43  ;;  %592 = vmatpush3.msra.mxu0 %v315_v56  ;;  %v486_v43 = vld [vmem:[#allocation3] sm:$0x1] }
  0x2c   :  { %550 = vmatprep.subr.mxu1 %v202_v44  ;;  %593 = vmatprep.subr.mxu0 %v314_v57  ;;  %v690_v44 = vmov 0  }
  0x2d   :  { %551 = vmatpush3.msra.mxu1 %v186_v45  ;;  %594 = vmatpush3.msra.mxu0 %v314_v57  ;;  %v523_v45 = vld [vmem:[%s893_s6] ss:$0 sm:$0xff]  ;;  %s691_s6 = smov [#allocation7]  }
  0x2e   :  { %552 = vmatprep.subr.mxu1 %v201_v46  ;;  %595 = vmatprep.subr.mxu0 %v313_v58  ;;  %s511_s8 = sshll.u32 %s691_s6, 4  ;;  %s512_s8 = int_to_ptr.vmem [resolvable:$true] %s511_s8 }
  0x2f   :  { %553 = vmatpush3.msra.mxu1 %v185_v47  ;;  %596 = vmatpush3.msra.mxu0 %v313_v58  ;;  %s661_s7 = scalar_lea.vmem %s512_s8, 16  ;;  %s665_s18 = scalar_lea.vmem %s512_s8, 32 }
  0x30   :  { %554 = vmatprep.subr.mxu1 %v200_v48  ;;  %597 = vmatprep.subr.mxu0 %v312_v59  ;;  %p662_p5 = scmp.ne.s32.totalorder %s512_s8, %s661_s7  ;;  %p666_p6 = scmp.lt.s32.totalorder %s512_s8, %s512_s8 }
  0x31   :  { %555 = vmatpush3.msra.mxu1 %v184_v49  ;;  %598 = vmatpush3.msra.mxu0 %v312_v59  ;;  %p667_p7 = scmp.lt.s32.totalorder %s665_s18, %s661_s7 }
  0x32   :  { %556 = vmatprep.subr.mxu1 %v199_v50  ;;  %599 = vmatprep.subr.mxu0 %v311_v60 }
  0x33   :  { %557 = vmatpush3.msra.mxu1 %v183_v51  ;;  %600 = vmatpush3.msra.mxu0 %v311_v60  ;;  %p668_p8 = por %p667_p7, %p666_p6 }
  0x34   :  { %558 = vmatprep.subr.mxu1 %v198_v52  ;;  %601 = vmatprep.subr.mxu0 %v310_v61 }
  0x35   :  { %559 = vmatpush3.msra.mxu1 %v182_v53  ;;  %602 = vmatpush3.msra.mxu0 %v310_v61  ;;  %p669_p9 = pnand %p668_p8, %p662_p5 }
  0x36   :  { %622 = vmatprep.subr.mxu1 %v688_v1  ;;  %603 = vmatprep.subr.mxu0 %v309_v62 }
  0x37   :  { %604 = vmatpush3.msra.mxu0 %v309_v62  ;;  %636 = vset.pattern.permute.xlu0 %v690_v44 }
  0x38   :  { %605 = vmatprep.subr.mxu0 %v308_v23  ;;  %489 = vperm.xlu0 %636, %v486_v43  }
  0x39   :  { %606 = vmatpush3.msra.mxu0 %v308_v23 }
  0x3a   :  { %607 = vmatprep.subr.mxu0 %v307_v24 }
  0x3b   :  { %608 = vmatpush3.msra.mxu0 %v307_v24 }
  0x3c   :  { %609 = vmatprep.subr.mxu0 %v306_v25 }
  0x3d   :  { %610 = vmatpush3.msra.mxu0 %v306_v25 }
  0x3e   :  { %611 = vmatprep.subr.mxu0 %v305_v26 }
  0x3f   :  { %612 = vmatpush3.msra.mxu0 %v305_v26 }
  0x40   :  { %613 = vmatprep.subr.mxu0 %v304_v27 }
  0x41   :  { %614 = vmatpush3.msra.mxu0 %v304_v27 }
  0x42   :  { %615 = vmatprep.subr.mxu0 %v303_v28 }
  0x43   :  { %616 = vmatpush3.msra.mxu0 %v303_v28 }
  0x44   :  { %617 = vmatprep.subr.mxu0 %v302_v29 }
  0x45   :  { %618 = vmatpush3.msra.mxu0 %v302_v29 }
  0xb3   :  { %v490_v55 = vpop.permute.xlu0 %489 }
  0xb4   :  { %v495_v56 = vrot.slane %v490_v55, %v79_v2 }
  0xe2   :  { %v159_v7 = vpop.f32.mrf.mxu0 }
  0xe3   :  { %v160_v8 = vadd.f32 %v159_v7, %v80_v5 }
  0xe4   :  { %v161_v9 = vpop.f32.mrf.mxu0 }
  0xe5   :  { %v162_v10 = vadd.f32 %v161_v9, %v84_v6  ;;  %v174_v11 = vmul.f32 0.2, %v160_v8  ;;  %vm170_vm3 = vcmp.gt.f32.partialorder %v160_v8, 0.0 }
  0xe6   :  { %v165_v12 = vpop.f32.mrf.mxu0 }
  0xe7   :  { %v166_v13 = vadd.f32 %v165_v12, %v80_v5  ;;  %vm171_vm2 = vcmp.gt.f32.partialorder %v162_v10, 0.0  ;;  %v175_v14 = vmul.f32 0.2, %v162_v10  ;;  %v178_v19 = vsel %vm170_vm3, %v160_v8, %v174_v11 }
  0xe8   :  { %v167_v15 = vpop.f32.mrf.mxu0 }
  0xe9   :  { %v168_v16 = vadd.f32 %v167_v15, %v84_v6  ;;  %v179_v17 = vsel %vm171_vm2, %v162_v10, %v175_v14  ;;  %v176_v18 = vmul.f32 0.2, %v166_v13  ;;  %vm172_vm5 = vcmp.gt.f32.partialorder %v166_v13, 0.0 }
  0xea   :  { %285 = vmatprep.mubr.f32.mxu1 %v179_v17 }
  0xeb   :  { %v177_v20 = vmul.f32 0.2, %v168_v16  ;;  %286 = vmatmul.mubr.f32.vlgmr.msra.gmra.mxu1 %v178_v19  ;;  %vm173_vm4 = vcmp.gt.f32.partialorder %v168_v16, 0.0  ;;  %v180_v22 = vsel %vm172_vm5, %v166_v13, %v176_v18 }
  0xed   :  { %v181_v21 = vsel %vm173_vm4, %v168_v16, %v177_v20 }
  0xee   :  { %290 = vmatprep.mubr.f32.mxu1 %v181_v21 }
  0xef   :  { %291 = vmatmul.mubr.f32.gmra.mxu1 %v180_v22 }
  0xf0   :  { %626 = vmatprep.mubr.msk.f32.mxu1 %vm689_vm8, %v688_v1 }
 0x1ab   :  { %v560_v30 = vpop.f32.mrf.mxu1 }
 0x1ad   :  { %v561_v32 = vpop.f32.mrf.mxu1 }
 0x1ae   :  { %v562_v33 = vadd.f32 %v561_v32, %v560_v30 }
 0x1af   :  { %v563_v34 = vpop.f32.mrf.mxu1 }
 0x1b0   :  { %v288_v35 = vadd.f32 %v562_v33, %v522_v31 }
 0x1b1   :  { %v564_v36 = vpop.f32.mrf.mxu1 }
 0x1b2   :  { %v565_v37 = vadd.f32 %v564_v36, %v563_v34  ;;  %vm296_vm6 = vcmp.gt.f32.partialorder %v288_v35, 0.0  ;;  %v298_v38 = vmul.f32 0.2, %v288_v35 }
 0x1b4   :  { %v293_v39 = vadd.f32 %v565_v37, %v522_v31  ;;  %v300_v40 = vsel %vm296_vm6, %v288_v35, %v298_v38 }
 0x1b5   :  { %619 = vmatprep.mubr.f32.mxu0 %v300_v40 }
 0x1b6   :  { %vm297_vm7 = vcmp.gt.f32.partialorder %v293_v39, 0.0  ;;  %v299_v41 = vmul.f32 0.2, %v293_v39 }
 0x1b8   :  { %v301_v42 = vsel %vm297_vm7, %v293_v39, %v299_v41 }
 0x1b9   :  { %620 = vmatmul.mubr.f32.vlgmr.msra.gmra.mxu0 %v301_v42 }
 0x279   :  { %v621_v46 = vpop.f32.mrf.mxu0 }
 0x27a   :  { %v397_v47 = vadd.f32 %v621_v46, %v523_v45 }
 0x27b   :  { %v391_v48 = vpop.f32.mrf.mxu0 }
 0x27c   :  { %vm401_vm9 = vcmp.gt.f32.partialorder %v397_v47, 0.0  ;;  %v403_v49 = vmul.f32 0.2, %v397_v47  ;;  %v392_v50 = vadd.f32 %v523_v45, %v391_v48 }
 0x27e   :  { %v405_v51 = vsel %vm401_vm9, %v397_v47, %v403_v49  ;;  %v402_v52 = vmul.f32 0.2, %v392_v50  ;;  %vm400_vm10 = vcmp.gt.f32.partialorder %v392_v50, 0.0 }
 0x27f   :  { %623 = vmatpush3.xpose.msk.msra.mxu1 %vm49_vm0, %v405_v51 }
 0x280   :  { %624 = vmatprep.subr.mxu1 %v688_v1  ;;  %v404_v53 = vsel %vm400_vm10, %v392_v50, %v402_v52 }
 0x283   :  { %625 = vmatpush3.xpose.msk.msra.mxu1 %vm49_vm0, %v404_v53 }
 0x286   :  { %627 = vmatmul.mubr.msk.f32.vlgmr.msra.gmra.mxu1 %vm49_vm0, %v406_v54 }
 0x346   :  { %v482_v57 = vpop.f32.mrf.mxu1 }
 0x347   :  { %v496_v58 = vadd.f32 %v495_v56, %v482_v57 }
 0x348   :  { %v628_v59 = vpop.f32.mrf.mxu1 }
 0x349   :  { %v527_v60 = vmul.f32 -1.442695, %v496_v58 }
 0x34b   :  { %637 = vpow2.f32 %v527_v60 }
 0x358   :  { %v638_v61 = vpop.eup %637 }
 0x359   :  { %v500_v1 = vadd.f32 1.0, %v638_v61 }
 0x35b   :  { %639 = vrcp.f32 %v500_v1 }
 0x368   :  { %v640_v62 = vpop.eup %639 }
 0x369   :  { %504 = vst.msk [vmem:[#allocation7] sm:$0x1] %vm503_vm11, %v640_v62 }
 0x36a   :  { %672 = shalt.err (!%p669_p9)
}
 0x36b   :  { %514 = dma.vmem_to_hbm [thread:$0]  %s512_s8, 16, %s896_s9, [#allocation6]  }
 0x36c   :  { %683 = dma.done.wait [#allocation6], 16  }
 0x36d   :  { %684 = vsyncadd [#allocation6], 4294967280 }
 0x36e   :  { %518 = vsyncpa [#allocation5], 1 }
 0x36f   :  { %519 = vsyncpa [#allocation6], 1 }

</bundles_post_ra>
